<compile_context>
chip_gen: v5e
topology: v5e:2x2
jax: 0.10.0
libtpu: 0.0.40
codegen_flags: <defaults>
</compile_context>

<pallas_src>
import jax
import jax.numpy as jnp
from jax.experimental import pallas as pl
from jax.experimental.pallas import tpu as pltpu


def _round_up(x, m):
    return (x + m - 1) // m * m


def _cdiv(a, b):
    return -(-a // b)


def _vmem_capacity_bytes():
    """Per-TensorCore VMEM capacity; conservative (v7x) fallback."""
    try:
        return int(pltpu.get_tpu_info().vmem_capacity_bytes)
    except Exception:
        return 64 << 20


def _choose_row_tile(n, c, itemsize, sub, budget_bytes):
    """Largest row tile whose full working set fits the VMEM budget.

    Per tile row:
      inputs : 2 logits matrices x 2 pipeline buffers x C x itemsize
      temps  : ~1 live f32 upcast + exp temp + int32 iota + onehot  ~= 4*C*4 B
    """
    per_row = 2 * 2 * c * itemsize + 4 * c * 4
    tm = budget_bytes // max(per_row, 1)
    tm = min(int(tm), 4096)
    tm -= tm % sub
    tm = max(tm, sub)
    tm = min(tm, _round_up(n, sub))              # never taller than the batch
    if n > sub:                                  # >=2 tiles so both v7x TCs get work
        tm = min(tm, _round_up(_cdiv(n, 2), sub))
    return max(tm, sub)


def _ce_pair_kernel(nv_ref, li_ref, lt_ref, lab_ref, out_ref):
    """One row tile: sum over valid rows of CE(image) + CE(text)."""
    i = pl.program_id(0)
    n_valid = nv_ref[0]                                      # SMEM scalar

    tm, c = li_ref.shape
    lab = lab_ref[...]                                       # (tm, 1) int32
    col = jax.lax.broadcasted_iota(jnp.int32, (tm, c), 1)
    onehot = col == lab                                      # shared by both CEs

    def ce_rows(ref):
        # Upcast inside the pass so only one (tm, C) f32 temp is live at a time.
        x = ref[...].astype(jnp.float32)
        m = jnp.max(x, axis=1, keepdims=True)
        lse = m + jnp.log(jnp.sum(jnp.exp(x - m), axis=1, keepdims=True))
        picked = jnp.sum(jnp.where(onehot, x, 0.0), axis=1, keepdims=True)
        return lse - picked                                  # (tm, 1)

    per_row = ce_rows(li_ref) + ce_rows(lt_ref)

    # Rows past n_valid (ragged tail / out-of-bounds part of the last block)
    # may hold garbage incl. NaN/Inf: neutralize with a select, never a mul.
    row = i * tm + jax.lax.broadcasted_iota(jnp.int32, (tm, 1), 0)
    per_row = jnp.where(row < n_valid, per_row, 0.0)

    partial = jnp.sum(per_row)                               # scalar tile sum
    # Lane-dense (8, 128) unmasked store; wrapper reads [:, 0, 0].
    out_ref[...] = jnp.broadcast_to(partial, out_ref.shape).astype(jnp.float32)


def contrastive_loss(logits_per_image, logits_per_text, ground_truth, *,
                     n_valid=None, row_tile=None):
    """Pallas TPU implementation of ContrastiveLoss.forward."""
    assert logits_per_image.shape == logits_per_text.shape == ground_truth.shape
    n, c = logits_per_image.shape
    if n_valid is None:
        n_valid = n

    # labels = argmax over classes (first max wins, matching torch.argmax).
    # Tiny XLA op; keeps the dense N x C ground-truth stream out of the kernel.
    labels = jnp.argmax(ground_truth, axis=1).astype(jnp.int32).reshape(n, 1)

    itemsize = max(jnp.dtype(logits_per_image.dtype).itemsize,
                   jnp.dtype(logits_per_text.dtype).itemsize)
    sub = max(8, 32 // itemsize)            # sublane packing: f32 -> 8, bf16 -> 16

    vmem_cap = _vmem_capacity_bytes()
    budget = max(vmem_cap // 2, 16 << 20)                      # working-set budget
    vmem_limit = max(min(vmem_cap - (8 << 20), budget + (16 << 20)), 32 << 20)

    if row_tile is None:
        tm = _choose_row_tile(n, c, itemsize, sub, budget)
    else:
        tm = max(_round_up(int(row_tile), sub), sub)

    nt = _cdiv(n, tm)                        # last block may run out of bounds
    nv = jnp.asarray([n_valid], dtype=jnp.int32)

    partials = pl.pallas_call(
        _ce_pair_kernel,
        out_shape=jax.ShapeDtypeStruct((nt, 8, 128), jnp.float32),
        grid_spec=pltpu.PrefetchScalarGridSpec(
            num_scalar_prefetch=1,
            grid=(nt,),
            in_specs=[
                pl.BlockSpec((tm, c), lambda i, nv: (i, 0)),   # image logits tile
                pl.BlockSpec((tm, c), lambda i, nv: (i, 0)),   # text  logits tile
                pl.BlockSpec((tm, 1), lambda i, nv: (i, 0)),   # int32 labels col
            ],
            out_specs=pl.BlockSpec((1, 8, 128), lambda i, nv: (i, 0, 0)),
        ),
        compiler_params=pltpu.CompilerParams(
            dimension_semantics=("parallel",),   # shard row tiles across TCs (v7x)
            vmem_limit_bytes=int(vmem_limit),
        ),
    )(nv, logits_per_image, logits_per_text, labels)

    # (mean CE_image + mean CE_text) / 2 == sum of per-row (ce_i + ce_t) / (2N)
    return jnp.sum(partials[:, 0, 0]) / (2.0 * n_valid)


def _reference_loss(li, lt, gt, n_valid=None):
    if n_valid is not None:
        li, lt, gt = li[:n_valid], lt[:n_valid], gt[:n_valid]
    labels = jnp.argmax(gt, axis=1)

    def ce(logits):
        logp = jax.nn.log_softmax(logits.astype(jnp.float32), axis=1)
        return -jnp.mean(jnp.take_along_axis(logp, labels[:, None], axis=1))

    return (ce(li) + ce(lt)) / 2.0


if __name__ == "__main__":
    key = jax.random.PRNGKey(0)
    k1, k2, k3, k4 = jax.random.split(key, 4)

    # --- small CLIP-style batch: N samples, N classes (square logits) -------
    N, C = 8, 8
    logits_per_image = jax.random.normal(k1, (N, C), dtype=jnp.float32) * 4.0
    logits_per_text = logits_per_image.T              # CLIP convention
    ground_truth = jnp.eye(N, C, dtype=jnp.float32)   # identity matching

    loss = contrastive_loss(logits_per_image, logits_per_text, ground_truth)
    jax.block_until_ready(loss)
    ref = _reference_loss(logits_per_image, logits_per_text, ground_truth)
    assert jnp.allclose(loss, ref, atol=1e-5, rtol=1e-5), (loss, ref)

    # --- non-one-hot ground truth (argmax tie-break path) -------------------
    gt_soft = jax.random.uniform(k2, (N, C), dtype=jnp.float32)
    loss2 = contrastive_loss(logits_per_image, logits_per_text, gt_soft)
    jax.block_until_ready(loss2)
    ref2 = _reference_loss(logits_per_image, logits_per_text, gt_soft)
    assert jnp.allclose(loss2, ref2, atol=1e-5, rtol=1e-5), (loss2, ref2)

    # --- bf16 logits, multi-tile grid, N not a multiple of the tile ---------
    # (no wrapper pad: last block runs out of bounds, row mask drops garbage)
    N2, C2 = 40, 384
    li = (jax.random.normal(k3, (N2, C2), dtype=jnp.float32) * 3.0).astype(jnp.bfloat16)
    lt = (jax.random.normal(k4, (N2, C2), dtype=jnp.float32) * 3.0).astype(jnp.bfloat16)
    gt = jax.nn.one_hot(jnp.arange(N2) % C2, C2, dtype=jnp.float32)
    loss3 = contrastive_loss(li, lt, gt, row_tile=16)   # 3 row tiles, last partial
    jax.block_until_ready(loss3)
    ref3 = _reference_loss(li, lt, gt)
    assert jnp.allclose(loss3, ref3, atol=1e-3, rtol=1e-3), (loss3, ref3)

    # --- bucketed ragged batch: caller pads to 48 rows with NaN and passes
    # n_valid through SMEM; select-based masking must drop the NaN rows ------
    pad = 8
    li_p = jnp.concatenate([li, jnp.full((pad, C2), jnp.nan, jnp.bfloat16)])
    lt_p = jnp.concatenate([lt, jnp.full((pad, C2), jnp.nan, jnp.bfloat16)])
    gt_p = jnp.concatenate([gt, jnp.zeros((pad, C2), jnp.float32)])
    loss4 = contrastive_loss(li_p, lt_p, gt_p, n_valid=N2, row_tile=16)
    jax.block_until_ready(loss4)
    assert jnp.allclose(loss4, ref3, atol=1e-3, rtol=1e-3), (loss4, ref3)

    print("KERNEL_OK")
</pallas_src>

<mosaic_0001>
module attributes {stable_mosaic.version = 11 : i64} {
  func.func @_ce_pair_kernel(%arg0: i32, %arg1: memref<1xi32, #tpu.memory_space<smem>>, %arg2: memref<8x8xf32, #tpu.memory_space<vmem>>, %arg3: memref<8x8xf32, #tpu.memory_space<vmem>>, %arg4: memref<8x1xi32, #tpu.memory_space<vmem>>, %arg5: memref<1x8x128xf32, #tpu.memory_space<vmem>>) attributes {dimension_semantics = [#tpu.dimension_semantics<parallel>], iteration_bounds = array<i64: 1>, scalar_prefetch = 1 : i64, scratch_operands = 0 : i64, tpu.core_type = #tpu.core_type<tc>, window_params = [{transform_indices = @transform_0, window_bounds = array<i64: 8, 8>}, {transform_indices = @transform_1, window_bounds = array<i64: 8, 8>}, {transform_indices = @transform_2, window_bounds = array<i64: 8, 1>}, {transform_indices = @transform_3, window_bounds = array<i64: 1, 8, 128>}]} {
    %c0 = arith.constant 0 : index
    %0 = memref.load %arg1[%c0] : memref<1xi32, #tpu.memory_space<smem>>
    %c0_0 = arith.constant 0 : index
    %c0_1 = arith.constant 0 : index
    %1 = vector.load %arg4[%c0_0, %c0_1] : memref<8x1xi32, #tpu.memory_space<vmem>>, vector<8x1xi32>
    %2 = tpu.iota {dimensions = array<i32: 1>} : vector<8x8xi32>
    %3 = vector.broadcast %1 : vector<8x1xi32> to vector<8x8xi32>
    %4 = arith.cmpi eq, %2, %3 : vector<8x8xi32>
    %c0_2 = arith.constant 0 : index
    %c0_3 = arith.constant 0 : index
    %5 = vector.load %arg2[%c0_2, %c0_3] : memref<8x8xf32, #tpu.memory_space<vmem>>, vector<8x8xf32>
    %cst = arith.constant dense<0xFF800000> : vector<8xf32>
    %6 = vector.multi_reduction <maximumf>, %5, %cst [1] : vector<8x8xf32> to vector<8xf32>
    %7 = vector.shape_cast %6 : vector<8xf32> to vector<8x1xf32>
    %8 = vector.broadcast %7 : vector<8x1xf32> to vector<8x8xf32>
    %9 = arith.subf %5, %8 : vector<8x8xf32>
    %10 = math.exp %9 : vector<8x8xf32>
    %cst_4 = arith.constant dense<0.000000e+00> : vector<8xf32>
    %11 = vector.multi_reduction <add>, %10, %cst_4 [1] : vector<8x8xf32> to vector<8xf32>
    %12 = vector.shape_cast %11 : vector<8xf32> to vector<8x1xf32>
    %13 = math.log %12 : vector<8x1xf32>
    %14 = arith.addf %7, %13 : vector<8x1xf32>
    %cst_5 = arith.constant 0.000000e+00 : f32
    %15 = vector.broadcast %cst_5 : f32 to vector<8x8xf32>
    %16 = arith.select %4, %5, %15 : vector<8x8xi1>, vector<8x8xf32>
    %cst_6 = arith.constant dense<0.000000e+00> : vector<8xf32>
    %17 = vector.multi_reduction <add>, %16, %cst_6 [1] : vector<8x8xf32> to vector<8xf32>
    %18 = vector.shape_cast %17 : vector<8xf32> to vector<8x1xf32>
    %19 = arith.subf %14, %18 : vector<8x1xf32>
    %c0_7 = arith.constant 0 : index
    %c0_8 = arith.constant 0 : index
    %20 = vector.load %arg3[%c0_7, %c0_8] : memref<8x8xf32, #tpu.memory_space<vmem>>, vector<8x8xf32>
    %cst_9 = arith.constant dense<0xFF800000> : vector<8xf32>
    %21 = vector.multi_reduction <maximumf>, %20, %cst_9 [1] : vector<8x8xf32> to vector<8xf32>
    %22 = vector.shape_cast %21 : vector<8xf32> to vector<8x1xf32>
    %23 = vector.broadcast %22 : vector<8x1xf32> to vector<8x8xf32>
    %24 = arith.subf %20, %23 : vector<8x8xf32>
    %25 = math.exp %24 : vector<8x8xf32>
    %cst_10 = arith.constant dense<0.000000e+00> : vector<8xf32>
    %26 = vector.multi_reduction <add>, %25, %cst_10 [1] : vector<8x8xf32> to vector<8xf32>
    %27 = vector.shape_cast %26 : vector<8xf32> to vector<8x1xf32>
    %28 = math.log %27 : vector<8x1xf32>
    %29 = arith.addf %22, %28 : vector<8x1xf32>
    %cst_11 = arith.constant 0.000000e+00 : f32
    %30 = vector.broadcast %cst_11 : f32 to vector<8x8xf32>
    %31 = arith.select %4, %20, %30 : vector<8x8xi1>, vector<8x8xf32>
    %cst_12 = arith.constant dense<0.000000e+00> : vector<8xf32>
    %32 = vector.multi_reduction <add>, %31, %cst_12 [1] : vector<8x8xf32> to vector<8xf32>
    %33 = vector.shape_cast %32 : vector<8xf32> to vector<8x1xf32>
    %34 = arith.subf %29, %33 : vector<8x1xf32>
    %35 = arith.addf %19, %34 : vector<8x1xf32>
    %c8_i32 = arith.constant 8 : i32
    %36 = arith.muli %arg0, %c8_i32 : i32
    %37 = tpu.iota {dimensions = array<i32: 0>} : vector<8x1xi32>
    %38 = vector.broadcast %36 : i32 to vector<8x1xi32>
    %39 = arith.addi %38, %37 : vector<8x1xi32>
    %40 = vector.broadcast %0 : i32 to vector<8x1xi32>
    %41 = arith.cmpi slt, %39, %40 : vector<8x1xi32>
    %cst_13 = arith.constant 0.000000e+00 : f32
    %42 = vector.broadcast %cst_13 : f32 to vector<8x1xf32>
    %43 = arith.select %41, %35, %42 : vector<8x1xi1>, vector<8x1xf32>
    %44 = vector.shape_cast %43 : vector<8x1xf32> to vector<1x8x1xf32>
    %cst_14 = arith.constant dense<0.000000e+00> : vector<1xf32>
    %45 = vector.multi_reduction <add>, %44, %cst_14 [1, 2] : vector<1x8x1xf32> to vector<1xf32>
    %46 = vector.shape_cast %45 : vector<1xf32> to vector<1x1x1xf32>
    %47 = vector.extract %46[0, 0, 0] : f32 from vector<1x1x1xf32>
    %48 = vector.broadcast %47 : f32 to vector<1x8x128xf32>
    %c0_15 = arith.constant 0 : index
    %c0_16 = arith.constant 0 : index
    %c0_17 = arith.constant 0 : index
    %49 = vector.load %arg5[%c0_15, %c0_16, %c0_17] : memref<1x8x128xf32, #tpu.memory_space<vmem>>, vector<1x8x128xf32>
    tpu.vector_store %arg5[%c0_15, %c0_16, %c0_17], %48 {strides = array<i32>} : memref<1x8x128xf32, #tpu.memory_space<vmem>>, vector<1x8x128xf32>,
    return
  }
  func.func @transform_0(%arg0: i32, %arg1: memref<1xi32, #tpu.memory_space<smem>>) -> (i32, i32) {
    %c0_i32 = arith.constant 0 : i32
    %c0_i32_0 = arith.constant 0 : i32
    return %arg0, %c0_i32 : i32, i32
  }
  func.func @transform_1(%arg0: i32, %arg1: memref<1xi32, #tpu.memory_space<smem>>) -> (i32, i32) {
    %c0_i32 = arith.constant 0 : i32
    %c0_i32_0 = arith.constant 0 : i32
    return %arg0, %c0_i32 : i32, i32
  }
  func.func @transform_2(%arg0: i32, %arg1: memref<1xi32, #tpu.memory_space<smem>>) -> (i32, i32) {
    %c0_i32 = arith.constant 0 : i32
    %c0_i32_0 = arith.constant 0 : i32
    return %arg0, %c0_i32 : i32, i32
  }
  func.func @transform_3(%arg0: i32, %arg1: memref<1xi32, #tpu.memory_space<smem>>) -> (i32, i32, i32) {
    %c0_i32 = arith.constant 0 : i32
    %c0_i32_0 = arith.constant 0 : i32
    %c0_i32_1 = arith.constant 0 : i32
    return %arg0, %c0_i32, %c0_i32_0 : i32, i32, i32
  }
}

</mosaic_0001>

<bundles_post_ra>
// kernel: tpu_custom_call.1
= control target key start
LH: loop header
LB: loop body
LE: loop exit
PB: predicated region body
PF: predicated region fallthrough
CT: control target
= control target key end

     0   :  { %10 = vsyncpa [#allocation5], 0  ;;  %s233_s0 = inlined_call_operand.<no memory space> [shape: s32[1], index: 0, kind: input, shape index: {}]   ;;  %s234_s1 = inlined_call_operand.vmem [shape: f32[8,8], index: 1, kind: input, shape index: {}]   ;;  %s235_s2 = inlined_call_operand.hbm [shape: f32[8,8], index: 2, kind: input, shape index: {}]   ;;  %s236_s3 = inlined_call_operand.vmem [shape: s32[8,1], index: 3, kind: input, shape index: {}]   ;;  %s237_s4 = inlined_call_operand.hbm [shape: f32[1,8,128], index: 4, kind: output, shape index: {}]  }
   0x1   :  { %11 = vsyncpa [#allocation6], 0  ;;  %s19_s17 = sshll.u32 %s235_s2, 4  ;;  %s182_s18 = smov [#allocation4]   ;;  %s20_s17 = int_to_ptr.hbm [resolvable:$true] %s19_s17 }
   0x2   :  { %s21_s19 = sshll.u32 %s182_s18, 4  ;;  %s22_s19 = int_to_ptr.vmem [resolvable:$true] %s21_s19 }
   0x3   :  { %24 = dma.hbm_to_vmem [thread:$0]  %s20_s17, 128, %s22_s19, [#allocation5]  }
   0x4   :  { %178 = dma.done.wait [#allocation5], 128  }
   0x5   :  { %179 = vsyncadd [#allocation5], 4294967168  ;;  %v183_v0 = vmov 0   ;;  %vm40_vm0 = vcmask 64512   ;;  %v39_v1 = vld [vmem:[%s234_s1] sm:$0xff]  ;;  %v33_v6 = vlaneseq  ;;  %v82_v34 = vstv %s233_s0  ;;  %s105_s26 = sshll.u32 %s237_s4, 4  ;;  %s106_s26 = int_to_ptr.hbm [resolvable:$true] %s105_s26 }
   0x6   :  { %120 = vset.pattern.permute.xlu1 %v183_v0  ;;  %121 = vset.pattern.permute.xlu0 %v183_v0  ;;  %v32_v2 = vld [vmem:[%s236_s3] sm:$0xff]  ;;  %v41_v3 = vsel %vm40_vm0, %v39_v1, -inf  ;;  %vm85_vm3 = vcmask 7168   ;;  %s184_s3 = smov [#allocation7]  }
   0x7   :  { %36 = vperm.xlu1 %120, %v32_v2   ;;  %42 = vmax.xlane.f32.xlu0 %v41_v3  ;;  %v58_v4 = vld [vmem:[#allocation4] sm:$0xff]  ;;  %v34_v7 = vand.u32 127, %v33_v6  ;;  %v79_v31 = vshrl.u32 %v33_v6, 7  ;;  %s103_s24 = sshll.u32 %s184_s3, 4  ;;  %s104_s24 = int_to_ptr.vmem [resolvable:$true] %s103_s24 }
   0x8   :  { %v59_v5 = vsel %vm40_vm0, %v58_v4, -inf }
   0x9   :  { %vm83_vm2 = vcmp.lt.s32.totalorder %v79_v31, %v82_v34 }
   0xf   :  { %60 = vmax.xlane.f32.xlu0 %v59_v5 }
  0x79   :  { %v37_v8 = vpop.permute.xlu1 %36 }
  0x7a   :  { %vm38_vm1 = vcmp.eq.s32.totalorder %v34_v7, %v37_v8  ;;  %v43_v9 = vpop.xlane.xlu0 %42 }
  0x7b   :  { %v71_v10 = vsel %vm38_vm1, %v58_v4, 0.0  ;;  %v44_v11 = vsub.f32 %v39_v1, %v43_v9  ;;  %v53_v21 = vsel %vm38_vm1, %v39_v1, 0.0 }
  0x7c   :  { %v72_v12 = vsel %vm40_vm0, %v71_v10, 0.0  ;;  %v54_v22 = vsel %vm40_vm0, %v53_v21, 0.0 }
  0x7d   :  { %73 = vadd.xlane.f32.xlu0 %v72_v12  ;;  %v45_v13 = vmul.f32 1.442695, %v44_v11 }
  0x7f   :  { %122 = vpow2.f32 %v45_v13 }
  0x82   :  { %v61_v14 = vpop.xlane.xlu0 %60 }
  0x83   :  { %v62_v15 = vsub.f32 %v58_v4, %v61_v14 }
  0x85   :  { %v123_v16 = vpop.eup %122  ;;  %v63_v17 = vmul.f32 1.442695, %v62_v15 }
  0x86   :  { %v47_v18 = vsel %vm40_vm0, %v123_v16, 0.0 }
  0x87   :  { %124 = vpow2.f32 %v63_v17  ;;  %48 = vadd.xlane.f32.xlu1 %v47_v18 }
  0x8d   :  { %v125_v19 = vpop.eup %124 }
  0x8e   :  { %v65_v20 = vsel %vm40_vm0, %v125_v19, 0.0 }
  0x8f   :  { %66 = vadd.xlane.f32.xlu2 %v65_v20 }
  0x97   :  { %55 = vadd.xlane.f32.xlu2 %v54_v22 }
  0xf0   :  { %v74_v30 = vpop.xlane.xlu0 %73 }
  0xfa   :  { %v49_v23 = vpop.xlane.xlu1 %48 }
  0xfb   :  { %126 = vlog2.f32 %v49_v23 }
 0x101   :  { %v127_v25 = vpop.eup %126 }
 0x102   :  { %v67_v24 = vpop.xlane.xlu2 %66  ;;  %v51_v26 = vmul.f32 0.6931472, %v127_v25 }
 0x103   :  { %128 = vlog2.f32 %v67_v24 }
 0x104   :  { %v52_v32 = vadd.f32 %v51_v26, %v43_v9 }
 0x109   :  { %v129_v27 = vpop.eup %128 }
 0x10a   :  { %v69_v28 = vmul.f32 0.6931472, %v129_v27  ;;  %v56_v29 = vpop.xlane.xlu2 %55 }
 0x10b   :  { %v57_v35 = vsub.f32 %v52_v32, %v56_v29 }
 0x10c   :  { %v70_v33 = vadd.f32 %v69_v28, %v61_v14 }
 0x10e   :  { %v75_v36 = vsub.f32 %v70_v33, %v74_v30 }
 0x110   :  { %v76_v37 = vadd.f32 %v75_v36, %v57_v35 }
 0x112   :  { %v84_v38 = vsel %vm83_vm2, %v76_v37, 0.0 }
 0x113   :  { %v86_v39 = vsel %vm85_vm3, %v84_v38, 0.0 }
 0x114   :  { %87 = vadd.xlane.f32.xlu2 %v86_v39 }
 0x187   :  { %v88_v40 = vpop.xlane.xlu2 %87 }
 0x188   :  { %v89_v41 = vrot.slane %v88_v40, 4 }
 0x18a   :  { %v90_v42 = vadd.f32 %v89_v41, %v88_v40 }
 0x18c   :  { %v91_v43 = vrot.slane %v90_v42, 2 }
 0x18e   :  { %v92_v44 = vadd.f32 %v91_v43, %v90_v42 }
 0x190   :  { %v93_v45 = vrot.slane %v92_v44, 1 }
 0x192   :  { %v94_v46 = vadd.f32 %v93_v45, %v92_v44 }
 0x194   :  { %115 = vpush %v94_v46 }
 0x1c5   :  { %s116_s27 = spop %115 }
 0x1c6   :  { %v96_v47 = vstv %s116_s27 }
 0x1c7   :  { %97 = vst [vmem:[#allocation7] sm:$0xff] %v96_v47 }
 0x1c8   :  { %108 = dma.vmem_to_hbm [thread:$0]  %s104_s24, 128, %s106_s26, [#allocation6]  }
 0x1c9   :  { %180 = dma.done.wait [#allocation6], 128  }
 0x1ca   :  { %181 = vsyncadd [#allocation6], 4294967168 }
 0x1cb   :  { %113 = vsyncpa [#allocation5], 1 }
 0x1cc   :  { %114 = vsyncpa [#allocation6], 1 }

</bundles_post_ra>
